<compile_context>
chip_gen: v6e
topology: v6e:2x2x1
jax: 0.10.0
libtpu: 0.0.40
codegen_flags: <defaults>
</compile_context>

<pallas_src>
import numpy as np
import jax
import jax.numpy as jnp
from jax.experimental import pallas as pl
from jax.experimental.pallas import tpu as pltpu


def skipgram_kernel(ids_ref, gv_ref, out_ref):
    # ids_ref : (1, C, TN) int32 -- slot 0 = focus id, slots 1..C-1 = context ids
    # gv_ref  : (V, V)     f32   -- Gram matrix of (embedding_mat * mask)
    # out_ref : (1, TN)    f32   -- logsigmoid(score), lane-dense
    _, C, TN = ids_ref.shape
    V, _ = gv_ref.shape
    inv_cm1 = 1.0 / float(C - 1)

    ids = ids_ref[...].reshape(C, TN)                            # drop leading 1
    iota_v = jax.lax.broadcasted_iota(jnp.int32, (V, TN), 0)     # row = vocab id

    # transposed one-hot of the focus id (V, TN), lanes = rows
    focus_ohT = ids[0:1, :] == iota_v

    # context id counts per row; C is tiny, so a static unroll is fine
    # (switch to lax.fori_loop(..., unroll=True) if chord_size ever grows large).
    cnt = (ids[1:2, :] == iota_v).astype(jnp.float32)
    for k in range(2, C):
        cnt = cnt + (ids[k:k + 1, :] == iota_v).astype(jnp.float32)

    # g[v, n] = sum_u Gv[v, u] * count[u, n]  -> one small f32 MXU matmul
    g = jnp.dot(gv_ref[...], cnt, preferred_element_type=jnp.float32)   # (V, TN)

    # pick the focus row of g (masked sublane reduce) and fold in 1/(C-1)
    score = jnp.sum(jnp.where(focus_ohT, g, 0.0), axis=0, keepdims=True) * inv_cm1

    # numerically-stable single-branch logsigmoid
    out_ref[...] = jnp.minimum(score, 0.0) - jnp.log1p(jnp.exp(-jnp.abs(score)))


def create_mask(vocab_size, embed_size):
    """Replicates SkipGram.createMask(simple=False)."""
    mask = np.zeros((vocab_size, embed_size), np.float32)
    for i in range(1, vocab_size):
        for j in [0, 12, 19, 24, 28, 31, 34, 36]:
            if i + j < embed_size:
                mask[i, i + j] = 1.0
    return jnp.asarray(mask)


def build_contexts(chords_np):
    """Replicates the python double-loop in SkipGram.forward (host-side glue)."""
    B, C = chords_np.shape
    contexts = np.zeros((B * C, C - 1), dtype=np.int32)
    count = 0
    for chord in chords_np:
        for focus in chord:
            ctx = [int(c) for c in chord if int(c) != int(focus)]
            contexts[count, : len(ctx)] = np.asarray(ctx, dtype=np.int32)
            count += 1
    return contexts


def _round_up(x, m):
    return ((x + m - 1) // m) * m


def _pick_tile_n(n_rows):
    """Adaptive row tile: as fat as useful (<= 1024 rows/step, each step is
    ~0.35us fixed overhead), but keep >= 2 grid steps when there is enough work
    so v7x's two TensorCores can both be used via the 'parallel' grid axis."""
    n_rows = max(int(n_rows), 1)
    tile = min(1024, _round_up(n_rows, 128))
    if n_rows >= 256:
        tile = min(tile, max(128, _round_up(-(-n_rows // 2), 128)))
    return tile


def _build_ids(chords_np, tile_n):
    """Host-side: (focus | contexts) packed as (G, C, TN) int32, row-padded to G*TN."""
    B, C = chords_np.shape
    N = B * C
    G = max(1, -(-N // tile_n))
    N_pad = G * tile_n
    ids = np.zeros((N_pad, C), np.int32)      # padded rows use id 0 (zero Gram row)
    count = 0
    for chord in chords_np:
        for focus in chord:
            ctx = [int(c) for c in chord if int(c) != int(focus)]
            ids[count, 0] = int(focus)
            if ctx:
                ids[count, 1:1 + len(ctx)] = np.asarray(ctx, dtype=np.int32)
            count += 1
    ids = ids.reshape(G, tile_n, C).transpose(0, 2, 1)   # (G, C, TN)
    return ids, N, N_pad, G


def skipgram_forward(chords, embedding_mat, mask, *, tile_n=None):
    """Pallas implementation of SkipGram.forward (simple=False). Returns (B*C, 1, 1)."""
    chords_np = np.asarray(chords)
    B, C = chords_np.shape
    V, E = embedding_mat.shape
    N = B * C

    if tile_n is None:
        tile_n = _pick_tile_n(N)

    ids_np, N, N_pad, G = _build_ids(chords_np, tile_n)
    ids = jnp.asarray(ids_np)                                         # (G, C, TN)

    # f32 masked weights and their Gram matrix (exact wrt the f32 reference).
    W = (embedding_mat * mask).astype(jnp.float32)                    # (V, E)
    assert not np.asarray(W[0]).any(), \
        "row 0 of embedding_mat*mask must be zero (padding_idx=0 semantics)"
    Gv = jnp.dot(W, W.T, preferred_element_type=jnp.float32)          # (V, V) f32

    cost = pl.CostEstimate(
        flops=2 * V * V * N_pad + (C + 1) * V * N_pad,
        transcendentals=2 * N_pad,
        bytes_accessed=ids.size * 4 + Gv.size * 4 + N_pad * 4,
    )

    out = pl.pallas_call(
        skipgram_kernel,
        out_shape=jax.ShapeDtypeStruct((1, N_pad), jnp.float32),
        grid=(G,),
        in_specs=[
            pl.BlockSpec((1, C, tile_n), lambda i: (i, 0, 0)),   # ids tile per step
            pl.BlockSpec((V, V), lambda i: (0, 0)),              # Gram matrix resident
        ],
        out_specs=pl.BlockSpec((1, tile_n), lambda i: (0, i)),   # lane-dense output
        compiler_params=pltpu.CompilerParams(
            dimension_semantics=("parallel",),
        ),
        cost_estimate=cost,
    )(ids, Gv)

    return out.reshape(N_pad)[:N].reshape(N, 1, 1)


def skipgram_reference(chords, embedding_mat, mask):
    """Pure-JAX reference mirroring the PyTorch forward."""
    chords_np = np.asarray(chords)
    B, C = chords_np.shape
    N = B * C
    contexts = jnp.asarray(build_contexts(chords_np))
    W = embedding_mat * mask
    embed_focus = W[jnp.asarray(chords_np.reshape(-1))]            # (N, E)
    embed_ctx = jnp.mean(W[contexts], axis=1)                      # (N, E)
    scores = jnp.sum(embed_focus * embed_ctx, axis=-1)             # (N,)
    return jax.nn.log_sigmoid(scores).reshape(N, 1, 1)


if __name__ == "__main__":
    vocab_size = 16
    embed_size = vocab_size + 36        # default: embed_size = vocab_size + 36
    batch, chord_size = 2, 4

    key = jax.random.PRNGKey(0)
    chords = jax.random.randint(key, (batch, chord_size), 1, vocab_size, dtype=jnp.int32)

    # parameters exactly as in __init__: embedding_mat = ones(V, E); mask from createMask(False)
    embedding_mat = jnp.ones((vocab_size, embed_size), jnp.float32)
    mask = create_mask(vocab_size, embed_size)

    log_prob = skipgram_forward(chords, embedding_mat, mask)
    jax.block_until_ready(log_prob)

    ref = skipgram_reference(chords, embedding_mat, mask)
    assert log_prob.shape == (batch * chord_size, 1, 1)
    assert np.allclose(np.asarray(log_prob), np.asarray(ref), rtol=1e-5, atol=1e-5), (
        np.asarray(log_prob).ravel(), np.asarray(ref).ravel())

    print("KERNEL_OK")
</pallas_src>

<mosaic_0001>
module attributes {stable_mosaic.version = 11 : i64} {
  func.func @skipgram_kernel(%arg0: i32, %arg1: memref<1x4x128xi32, #tpu.memory_space<vmem>>, %arg2: memref<16x16xf32, #tpu.memory_space<vmem>>, %arg3: memref<1x128xf32, #tpu.memory_space<vmem>>) attributes {dimension_semantics = [#tpu.dimension_semantics<parallel>], iteration_bounds = array<i64: 1>, scalar_prefetch = 0 : i64, scratch_operands = 0 : i64, tpu.core_type = #tpu.core_type<tc>, window_params = [{transform_indices = @transform_0, window_bounds = array<i64: 1, 4, 128>}, {pipeline_mode = #tpu.pipeline_mode<synchronous>, transform_indices = @transform_1, window_bounds = array<i64: 16, 16>}, {transform_indices = @transform_2, window_bounds = array<i64: 1, 128>}]} {
    %c0 = arith.constant 0 : index
    %c0_0 = arith.constant 0 : index
    %c0_1 = arith.constant 0 : index
    %0 = vector.load %arg1[%c0, %c0_0, %c0_1] : memref<1x4x128xi32, #tpu.memory_space<vmem>>, vector<1x4x128xi32>
    %1 = vector.shape_cast %0 : vector<1x4x128xi32> to vector<4x128xi32>
    %2 = tpu.iota {dimensions = array<i32: 0>} : vector<16x128xi32>
    %3 = vector.extract_strided_slice %1 {offsets = [0, 0], sizes = [1, 128], strides = [1, 1]} : vector<4x128xi32> to vector<1x128xi32>
    %4 = vector.broadcast %3 : vector<1x128xi32> to vector<16x128xi32>
    %5 = arith.cmpi eq, %4, %2 : vector<16x128xi32>
    %6 = vector.extract_strided_slice %1 {offsets = [1, 0], sizes = [1, 128], strides = [1, 1]} : vector<4x128xi32> to vector<1x128xi32>
    %7 = vector.broadcast %6 : vector<1x128xi32> to vector<16x128xi32>
    %8 = arith.cmpi eq, %7, %2 : vector<16x128xi32>
    %9 = arith.extui %8 : vector<16x128xi1> to vector<16x128xi32>
    %10 = arith.sitofp %9 : vector<16x128xi32> to vector<16x128xf32>
    %11 = vector.extract_strided_slice %1 {offsets = [2, 0], sizes = [1, 128], strides = [1, 1]} : vector<4x128xi32> to vector<1x128xi32>
    %12 = vector.broadcast %11 : vector<1x128xi32> to vector<16x128xi32>
    %13 = arith.cmpi eq, %12, %2 : vector<16x128xi32>
    %14 = arith.extui %13 : vector<16x128xi1> to vector<16x128xi32>
    %15 = arith.sitofp %14 : vector<16x128xi32> to vector<16x128xf32>
    %16 = arith.addf %10, %15 : vector<16x128xf32>
    %17 = vector.extract_strided_slice %1 {offsets = [3, 0], sizes = [1, 128], strides = [1, 1]} : vector<4x128xi32> to vector<1x128xi32>
    %18 = vector.broadcast %17 : vector<1x128xi32> to vector<16x128xi32>
    %19 = arith.cmpi eq, %18, %2 : vector<16x128xi32>
    %20 = arith.extui %19 : vector<16x128xi1> to vector<16x128xi32>
    %21 = arith.sitofp %20 : vector<16x128xi32> to vector<16x128xf32>
    %22 = arith.addf %16, %21 : vector<16x128xf32>
    %c0_2 = arith.constant 0 : index
    %c0_3 = arith.constant 0 : index
    %23 = vector.load %arg2[%c0_2, %c0_3] : memref<16x16xf32, #tpu.memory_space<vmem>>, vector<16x16xf32>
    %cst = arith.constant dense<0.000000e+00> : vector<16x128xf32>
    %24 = tpu.matmul %23, %22, %cst {dimension_numbers = #tpu.dot_dimension_numbers<[1], [0], [0], [1], [0, 0, 1, 1], [], []>} : vector<16x16xf32>, vector<16x128xf32>, vector<16x128xf32> -> vector<16x128xf32>
    %cst_4 = arith.constant 0.000000e+00 : f32
    %25 = vector.broadcast %cst_4 : f32 to vector<16x128xf32>
    %26 = arith.select %5, %24, %25 : vector<16x128xi1>, vector<16x128xf32>
    %cst_5 = arith.constant dense<0.000000e+00> : vector<128xf32>
    %27 = vector.multi_reduction <add>, %26, %cst_5 [0] : vector<16x128xf32> to vector<128xf32>
    %28 = vector.shape_cast %27 : vector<128xf32> to vector<1x128xf32>
    %cst_6 = arith.constant 0.333333343 : f32
    %29 = vector.broadcast %cst_6 : f32 to vector<1x128xf32>
    %30 = arith.mulf %28, %29 : vector<1x128xf32>
    %cst_7 = arith.constant 0.000000e+00 : f32
    %31 = vector.broadcast %cst_7 : f32 to vector<1x128xf32>
    %32 = arith.minimumf %30, %31 : vector<1x128xf32>
    %33 = math.absf %30 : vector<1x128xf32>
    %cst_8 = arith.constant 0.000000e+00 : f32
    %34 = vector.broadcast %cst_8 : f32 to vector<1x128xf32>
    %35 = arith.subf %34, %33 : vector<1x128xf32>
    %36 = math.exp %35 : vector<1x128xf32>
    %37 = math.log1p %36 : vector<1x128xf32>
    %38 = arith.subf %32, %37 : vector<1x128xf32>
    %c0_9 = arith.constant 0 : index
    %c0_10 = arith.constant 0 : index
    %39 = vector.load %arg3[%c0_9, %c0_10] : memref<1x128xf32, #tpu.memory_space<vmem>>, vector<1x128xf32>
    tpu.vector_store %arg3[%c0_9, %c0_10], %38 {strides = array<i32>} : memref<1x128xf32, #tpu.memory_space<vmem>>, vector<1x128xf32>,
    return
  }
  func.func @transform_0(%arg0: i32) -> (i32, i32, i32) {
    %c0_i32 = arith.constant 0 : i32
    %c0_i32_0 = arith.constant 0 : i32
    %c0_i32_1 = arith.constant 0 : i32
    return %arg0, %c0_i32, %c0_i32_0 : i32, i32, i32
  }
  func.func @transform_1(%arg0: i32) -> (i32, i32) {
    %c0_i32 = arith.constant 0 : i32
    %c0_i32_0 = arith.constant 0 : i32
    %c0_i32_1 = arith.constant 0 : i32
    return %c0_i32, %c0_i32_0 : i32, i32
  }
  func.func @transform_2(%arg0: i32) -> (i32, i32) {
    %c0_i32 = arith.constant 0 : i32
    %c0_i32_0 = arith.constant 0 : i32
    return %c0_i32, %arg0 : i32, i32
  }
}

</mosaic_0001>

<bundles_post_ra>
// kernel: tpu_custom_call.1
= control target key start
LH: loop header
LB: loop body
LE: loop exit
PB: predicated region body
PF: predicated region fallthrough
CT: control target
= control target key end

     0   :  { %7 = vsyncpa [#allocation3], 0  ;;  %s335_s0 = inlined_call_operand.hbm [shape: s32[1,4,128], index: 0, kind: input, shape index: {}]   ;;  %s336_s1 = inlined_call_operand.hbm [shape: f32[16,16], index: 1, kind: input, shape index: {}]   ;;  %s337_s2 = inlined_call_operand.hbm [shape: f32[1,128], index: 2, kind: output, shape index: {}]  }
   0x1   :  { %8 = vsyncpa [#allocation6], 0 }
   0x2   :  { %9 = vsyncpa [#allocation4], 0  ;;  %s303_s9 = smov [#allocation2]   ;;  %s304_s11 = smov [#allocation5]  }
   0x3   :  { %s16_s10 = sshll.u32 %s303_s9, 4  ;;  %s25_s12 = sshll.u32 %s304_s11, 4  ;;  %s17_s10 = int_to_ptr.vmem [resolvable:$true] %s16_s10  ;;  %s26_s12 = int_to_ptr.vmem [resolvable:$true] %s25_s12 }
   0x4   :  { %s245_s13 = scalar_lea.vmem %s17_s10, 64  ;;  %p250_p1 = scmp.lt.s32.totalorder %s17_s10, %s17_s10 }
   0x5   :  { %p246_p0 = scmp.ne.s32.totalorder %s17_s10, %s245_s13  ;;  %p251_p2 = scmp.lt.s32.totalorder %s245_s13, %s245_s13 }
   0x7   :  { %p252_p3 = por %p251_p2, %p250_p1 }
   0x9   :  { %p253_p4 = pnand %p252_p3, %p246_p0 }
   0xb   :  { %256 = shalt.err (!%p253_p4)
}
   0xc   :  { %19 = dma.hbm_to_vmem [thread:$0]  %s335_s0, 64, %s17_s10, [#allocation3]  }
   0xd   :  { %s265_s16 = scalar_lea.vmem %s26_s12, 256  ;;  %p270_p6 = scmp.lt.s32.totalorder %s26_s12, %s26_s12 }
   0xe   :  { %p266_p5 = scmp.ne.s32.totalorder %s26_s12, %s265_s16  ;;  %p271_p7 = scmp.lt.s32.totalorder %s265_s16, %s265_s16 }
  0x10   :  { %p272_p8 = por %p271_p7, %p270_p6 }
  0x12   :  { %p273_p9 = pnand %p272_p8, %p266_p5 }
  0x14   :  { %276 = shalt.err (!%p273_p9)
}
  0x15   :  { %s305_s17 = smov 128   ;;  %s306_s18 = smov 8  }
  0x16   :  { %31 = dma.hbm_to_vmem [thread:$0]  %s336_s1, 256, %s26_s12, [#allocation6], %s305_s17, %s305_s17, %s306_s18  }
  0x17   :  { %297 = dma.done.wait [#allocation3], 64  }
  0x18   :  { %298 = vsyncadd [#allocation3], 4294967232 }
  0x19   :  { %299 = dma.done.wait [#allocation6], 256  }
  0x1a   :  { %300 = vsyncadd [#allocation6], 4294967040  ;;  %v39_v0 = vlaneseq  ;;  %vm84_vm0 = vcmask 130048   ;;  %v38_v7 = vld [vmem:[#allocation2] sm:$0xf]  ;;  %v82_v8 = vld [vmem:[#allocation5] sm:$0xff] }
  0x1b   :  { %224 = vmatprep.mubr.msk.f32.mxu0 %vm84_vm0, %v82_v8  ;;  %v307_v13 = vmov 0.0   ;;  %v83_v24 = vld [vmem:[#allocation5 + $0x8] sm:$0xff]  ;;  %s308_s0 = smov [#allocation7]  }
  0x1c   :  { %v40_v1 = vshrl.u32 %v39_v0, 7  ;;  %s198_s1 = sshll.u32 %s308_s0, 4  ;;  %s199_s1 = int_to_ptr.vmem [resolvable:$true] %s198_s1 }
  0x1d   :  { %s277_s21 = scalar_lea.vmem %s199_s1, 16  ;;  %s281_s22 = scalar_lea.vmem %s199_s1, 32 }
  0x1e   :  { %v50_v2 = vsub.s32 1, %v40_v1  ;;  %v60_v3 = vsub.s32 2, %v40_v1  ;;  %v72_v4 = vsub.s32 3, %v40_v1  ;;  %v44_v5 = vsub.s32 0, %v40_v1  ;;  %p278_p10 = scmp.ne.s32.totalorder %s199_s1, %s277_s21  ;;  %p282_p11 = scmp.lt.s32.totalorder %s199_s1, %s199_s1 }
  0x1f   :  { %v41_v6 = vadd.s32 8, %v40_v1  ;;  %p283_p12 = scmp.lt.s32.totalorder %s281_s22, %s277_s21 }
  0x20   :  { %v51_v9 = vrot.slane %v38_v7, %v50_v2  ;;  %v61_v10 = vrot.slane %v38_v7, %v60_v3  ;;  %v73_v11 = vrot.slane %v38_v7, %v72_v4  ;;  %v45_v12 = vrot.slane %v38_v7, %v44_v5 }
  0x21   :  { %p284_p13 = por %p283_p12, %p282_p11 }
  0x22   :  { %vm53_vm1 = vcmp.eq.s32.totalorder %v51_v9, %v41_v6  ;;  %vm63_vm2 = vcmp.eq.s32.totalorder %v61_v10, %v41_v6  ;;  %vm75_vm3 = vcmp.eq.s32.totalorder %v73_v11, %v41_v6  ;;  %vm52_vm4 = vcmp.eq.s32.totalorder %v51_v9, %v40_v1 }
  0x23   :  { %v209_v14 = vsel %vm53_vm1, 1.0, %v307_v13  ;;  %v211_v15 = vsel %vm63_vm2, 1.0, %v307_v13  ;;  %v213_v16 = vsel %vm75_vm3, 1.0, %v307_v13  ;;  %v208_v17 = vsel %vm52_vm4, 1.0, %v307_v13  ;;  %p285_p0 = pnand %p284_p13, %p278_p10 }
  0x24   :  { %v69_v18 = vadd.f32 %v211_v15, %v209_v14  ;;  %vm62_vm5 = vcmp.eq.s32.totalorder %v61_v10, %v40_v1  ;;  %vm74_vm6 = vcmp.eq.s32.totalorder %v73_v11, %v40_v1  ;;  %vm47_vm7 = vcmp.eq.s32.totalorder %v45_v12, %v41_v6 }
  0x25   :  { %v210_v19 = vsel %vm62_vm5, 1.0, %v307_v13  ;;  %v212_v20 = vsel %vm74_vm6, 1.0, %v307_v13  ;;  %vm46_vm8 = vcmp.eq.s32.totalorder %v45_v12, %v40_v1 }
  0x26   :  { %v81_v21 = vadd.f32 %v213_v16, %v69_v18  ;;  %v68_v22 = vadd.f32 %v210_v19, %v208_v17 }
  0x28   :  { %220 = vmatprep.subr.mxu0 %v81_v21  ;;  %v80_v23 = vadd.f32 %v212_v20, %v68_v22 }
  0x29   :  { %221 = vmatpush3.msra.mxu0 %v81_v21 }
  0x2a   :  { %222 = vmatprep.subr.mxu0 %v80_v23 }
  0x2b   :  { %223 = vmatpush3.msra.mxu0 %v80_v23 }
  0x2c   :  { %225 = vmatmul.mubr.msk.f32.vlgmr.msra.gmra.mxu0 %vm84_vm0, %v83_v24 }
  0xec   :  { %v226_v25 = vpop.f32.mrf.mxu0 }
  0xed   :  { %v167_v27 = vsel %vm47_vm7, %v226_v25, 0.0 }
  0xee   :  { %v157_v26 = vpop.f32.mrf.mxu0 }
  0xef   :  { %v166_v28 = vsel %vm46_vm8, %v157_v26, 0.0 }
  0xf0   :  { %v168_v29 = vadd.f32 %v167_v27, %v166_v28 }
  0xf2   :  { %v169_v30 = vrot.slane %v168_v29, 4 }
  0xf4   :  { %v170_v31 = vadd.f32 %v169_v30, %v168_v29 }
  0xf6   :  { %v171_v32 = vrot.slane %v170_v31, 2 }
  0xf8   :  { %v172_v33 = vadd.f32 %v171_v32, %v170_v31 }
  0xfa   :  { %v173_v34 = vrot.slane %v172_v33, 1 }
  0xfc   :  { %v174_v35 = vadd.f32 %v173_v34, %v172_v33 }
  0xfe   :  { %v175_v36 = vmul.f32 0.33333334, %v174_v35 }
 0x100   :  { %v177_v37 = vand.u32 2147483647, %v175_v36  ;;  %v176_v48 = vmin.f32 %v175_v36, 0.0 }
 0x102   :  { %v178_v38 = vsub.f32 0.0, %v177_v37 }
 0x104   :  { %v179_v39 = vmul.f32 1.442695, %v178_v38 }
 0x106   :  { %233 = vpow2.f32 %v179_v39 }
 0x113   :  { %v234_v40 = vpop.eup %233 }
 0x114   :  { %v181_v41 = vadd.f32 1.0, %v234_v40  ;;  %v184_v42 = vmul.f32 -0.5, %v234_v40  ;;  %v187_v44 = vand.u32 2147483647, %v234_v40 }
 0x116   :  { %235 = vlog2.f32 %v181_v41  ;;  %v185_v43 = vadd.f32 1.0, %v184_v42  ;;  %vm188_vm9 = vcmp.lt.f32.partialorder %v187_v44, 0.0004427343 }
 0x118   :  { %v186_v47 = vmul.f32 %v234_v40, %v185_v43 }
 0x123   :  { %v236_v45 = vpop.eup %235 }
 0x124   :  { %v183_v46 = vmul.f32 0.6931472, %v236_v45 }
 0x126   :  { %v189_v49 = vsel %vm188_vm9, %v186_v47, %v183_v46 }
 0x127   :  { %v190_v50 = vsub.f32 %v176_v48, %v189_v49 }
 0x129   :  { %191 = vst [vmem:[#allocation7] sm:$0x1] %v190_v50 }
 0x12a   :  { %288 = shalt.err (!%p285_p0)
}
 0x12b   :  { %201 = dma.vmem_to_hbm [thread:$0]  %s199_s1, 16, %s337_s2, [#allocation4]  }
 0x12c   :  { %301 = dma.done.wait [#allocation4], 16  }
 0x12d   :  { %302 = vsyncadd [#allocation4], 4294967280 }
 0x12e   :  { %205 = vsyncpa [#allocation3], 1 }
 0x12f   :  { %206 = vsyncpa [#allocation6], 1 }
 0x130   :  { %207 = vsyncpa [#allocation4], 1 }

</bundles_post_ra>
